<compile_context>
chip_gen: v5e
topology: v5e:2x2
jax: 0.10.0
libtpu: 0.0.40
codegen_flags: <defaults>
</compile_context>

<pallas_src>
import math

import jax
import jax.numpy as jnp
from jax.experimental import pallas as pl
from jax.experimental.pallas import tpu as pltpu


def prenet_kernel(a_ref, w_ref, b_ref, keep_ref, o_ref):
    # a_ref:    (RT, G*K*Cin)     grouped im2col rows
    # w_ref:    (G*K*Cin, G*Cout) block-diagonal conv weight (kron(I_G, W))
    # b_ref:    (1, G*Cout)       bias, tiled G times
    # keep_ref: (RT, G*Cout)      1.0 = keep, 0.0 = masked_fill(0)
    # o_ref:    (RT, G*Cout)      lane-dense output slab
    y = jnp.dot(a_ref[...], w_ref[...], preferred_element_type=jnp.float32)
    y = y + b_ref[...]

    # Mish(y) = y * tanh(softplus(y)) = y * ((1+e^y)^2 - 1) / ((1+e^y)^2 + 1)
    # Clamp at 20: for y > 20, tanh(softplus(y)) == 1 at f32 precision.
    t = jnp.exp(jnp.minimum(y, 20.0))
    u = (1.0 + t) * (1.0 + t)
    tanh_sp = jnp.minimum((u - 1.0) * pl.reciprocal(u + 1.0, approx=True), 1.0)
    y = y * tanh_sp

    # masked_fill(mask, 0): exact (NaN/Inf-safe) via where, not a multiply.
    y = jnp.where(keep_ref[...] > 0.0, y, 0.0)
    o_ref[...] = y.astype(o_ref.dtype)


def prenet_forward(x, weight, bias, mask=None, *, compute_dtype=jnp.float32):
    """x: (B, T, Cin); weight: (Cout, Cin, K) (PyTorch Conv1d layout); bias: (Cout,);
    mask: optional (B, T) bool (True = zero out).  Returns (B, T, Cout) in x.dtype."""
    B, T, Cin = x.shape
    Cout, _, K = weight.shape
    pad = (K - 1) // 2

    # ---- im2col (folds the 'same' padding): A[b*T+t, k*Cin+c] = xpad[b, t+k, c]
    xpad = jnp.pad(x, ((0, 0), (pad, pad), (0, 0)))
    cols = jnp.stack([xpad[:, k:k + T, :] for k in range(K)], axis=2)   # (B,T,K,Cin)
    A = cols.reshape(B * T, K * Cin)

    # ---- group G rows so each stored row has G*Cout lanes (multiple of 128)
    G = 128 // math.gcd(Cout, 128)
    N = B * T
    rows = pl.cdiv(N, G)
    row_tile = min(256, max(8, ((rows + 7) // 8) * 8))   # bounded for v7x VMEM
    rows_pad = pl.cdiv(rows, row_tile) * row_tile
    n_pad_rows = rows_pad * G

    if n_pad_rows != N:
        A = jnp.pad(A, ((0, n_pad_rows - N), (0, 0)))

    W_mat = jnp.transpose(weight, (2, 1, 0)).reshape(K * Cin, Cout)   # [k*Cin+c, o]
    W_bd = jnp.kron(jnp.eye(G, dtype=W_mat.dtype), W_mat)             # (G*K*Cin, G*Cout)
    b_slab = jnp.tile(bias, G).reshape(1, G * Cout).astype(jnp.float32)

    if mask is None:
        keep = jnp.ones((N,), jnp.float32)
    else:
        keep = jnp.where(mask.reshape(N), 0.0, 1.0).astype(jnp.float32)
    keep = jnp.pad(keep, (0, n_pad_rows - N))
    keep_slab = jnp.broadcast_to(keep[:, None],
                                 (n_pad_rows, Cout)).reshape(rows_pad, G * Cout)

    A_g = A.reshape(rows_pad, G * K * Cin).astype(compute_dtype)
    W_bd = W_bd.astype(compute_dtype)

    out_slab = pl.pallas_call(
        prenet_kernel,
        out_shape=jax.ShapeDtypeStruct((rows_pad, G * Cout), x.dtype),
        grid_spec=pltpu.PrefetchScalarGridSpec(
            num_scalar_prefetch=0,
            grid=(rows_pad // row_tile,),
            in_specs=[
                pl.BlockSpec((row_tile, G * K * Cin), lambda r: (r, 0)),
                pl.BlockSpec((G * K * Cin, G * Cout), lambda r: (0, 0)),
                pl.BlockSpec((1, G * Cout), lambda r: (0, 0)),
                pl.BlockSpec((row_tile, G * Cout), lambda r: (r, 0)),
            ],
            out_specs=pl.BlockSpec((row_tile, G * Cout), lambda r: (r, 0)),
        ),
        compiler_params=pltpu.CompilerParams(
            dimension_semantics=("parallel",)),
    )(A_g, W_bd, b_slab, keep_slab)

    return out_slab.reshape(n_pad_rows, Cout)[:N].reshape(B, T, Cout)


def prenet_reference(x, weight, bias, mask, pad):
    """Plain-JAX reference mirroring PyTorch Conv1d + Mish + masked_fill."""
    y = jax.lax.conv_general_dilated(
        jnp.transpose(x, (0, 2, 1)), weight,
        window_strides=(1,), padding=[(pad, pad)],
        dimension_numbers=("NCH", "OIH", "NCH"))
    y = y + bias[None, :, None]
    y = y * jnp.tanh(jax.nn.softplus(y))                 # Mish
    y = jnp.transpose(y, (0, 2, 1))                      # back to (B, T, Cout)
    if mask is not None:
        y = jnp.where(mask[..., None], 0.0, y)
    return y


if __name__ == "__main__":
    # config-equivalent hyperparameters
    d_model = 32          # transformer.encoder_hidden
    kernel_size = 5       # prenet.conv_kernel_size (odd -> same padding)
    input_dim = 16        # prenet.input_dim
    B, T = 2, 16
    pad = (kernel_size - 1) // 2

    key = jax.random.PRNGKey(0)
    kx, kw, kb, km = jax.random.split(key, 4)
    x = jax.random.normal(kx, (B, T, input_dim), jnp.float32)
    # deterministic synthetic parameters (PyTorch Conv1d weight layout)
    weight = 0.1 * jax.random.normal(kw, (d_model, input_dim, kernel_size),
                                     jnp.float32)
    bias = 0.01 * jax.random.normal(kb, (d_model,), jnp.float32)
    mask = jax.random.bernoulli(km, 0.25, (B, T))        # True = masked

    ref = prenet_reference(x, weight, bias, mask, pad)

    # f32 MXU inputs (v5e-friendly); approx-reciprocal Mish -> slightly looser tol.
    out = jax.block_until_ready(prenet_forward(x, weight, bias, mask))
    assert out.shape == (B, T, d_model)
    assert jnp.allclose(out, ref, atol=5e-3, rtol=5e-3), "f32 mismatch vs reference"

    # bf16 MXU inputs (native on v6e/v7x), f32 accumulate + f32 elementwise.
    out_bf16 = jax.block_until_ready(
        prenet_forward(x, weight, bias, mask, compute_dtype=jnp.bfloat16))
    assert jnp.allclose(out_bf16, ref, atol=3e-2, rtol=3e-2), "bf16 mismatch vs ref"

    # no-mask path
    out_nm = jax.block_until_ready(prenet_forward(x, weight, bias, None))
    ref_nm = prenet_reference(x, weight, bias, None, pad)
    assert jnp.allclose(out_nm, ref_nm, atol=5e-3, rtol=5e-3), "no-mask mismatch"

    print("KERNEL_OK")
</pallas_src>

<mosaic_0001>
module attributes {stable_mosaic.version = 11 : i64} {
  func.func @prenet_kernel(%arg0: i32, %arg1: memref<8x320xf32, #tpu.memory_space<vmem>>, %arg2: memref<320x128xf32, #tpu.memory_space<vmem>>, %arg3: memref<1x128xf32, #tpu.memory_space<vmem>>, %arg4: memref<8x128xf32, #tpu.memory_space<vmem>>, %arg5: memref<8x128xf32, #tpu.memory_space<vmem>>) attributes {dimension_semantics = [#tpu.dimension_semantics<parallel>], iteration_bounds = array<i64: 1>, scalar_prefetch = 0 : i64, scratch_operands = 0 : i64, tpu.core_type = #tpu.core_type<tc>, window_params = [{transform_indices = @transform_0, window_bounds = array<i64: 8, 320>}, {pipeline_mode = #tpu.pipeline_mode<synchronous>, transform_indices = @transform_1, window_bounds = array<i64: 320, 128>}, {pipeline_mode = #tpu.pipeline_mode<synchronous>, transform_indices = @transform_2, window_bounds = array<i64: 1, 128>}, {transform_indices = @transform_3, window_bounds = array<i64: 8, 128>}, {transform_indices = @transform_4, window_bounds = array<i64: 8, 128>}]} {
    %c0 = arith.constant 0 : index
    %c0_0 = arith.constant 0 : index
    %0 = vector.load %arg1[%c0, %c0_0] : memref<8x320xf32, #tpu.memory_space<vmem>>, vector<8x320xf32>
    %c0_1 = arith.constant 0 : index
    %c0_2 = arith.constant 0 : index
    %1 = vector.load %arg2[%c0_1, %c0_2] : memref<320x128xf32, #tpu.memory_space<vmem>>, vector<320x128xf32>
    %cst = arith.constant dense<0.000000e+00> : vector<8x128xf32>
    %2 = tpu.matmul %0, %1, %cst {dimension_numbers = #tpu.dot_dimension_numbers<[1], [0], [0], [1], [0, 0, 1, 1], [], []>} : vector<8x320xf32>, vector<320x128xf32>, vector<8x128xf32> -> vector<8x128xf32>
    %c0_3 = arith.constant 0 : index
    %c0_4 = arith.constant 0 : index
    %3 = vector.load %arg3[%c0_3, %c0_4] : memref<1x128xf32, #tpu.memory_space<vmem>>, vector<1x128xf32>
    %4 = vector.broadcast %3 : vector<1x128xf32> to vector<8x128xf32>
    %5 = arith.addf %2, %4 : vector<8x128xf32>
    %cst_5 = arith.constant 2.000000e+01 : f32
    %6 = vector.broadcast %cst_5 : f32 to vector<8x128xf32>
    %7 = arith.minimumf %5, %6 : vector<8x128xf32>
    %8 = math.exp %7 : vector<8x128xf32>
    %cst_6 = arith.constant 1.000000e+00 : f32
    %9 = vector.broadcast %cst_6 : f32 to vector<8x128xf32>
    %10 = arith.addf %9, %8 : vector<8x128xf32>
    %cst_7 = arith.constant 1.000000e+00 : f32
    %11 = vector.broadcast %cst_7 : f32 to vector<8x128xf32>
    %12 = arith.addf %11, %8 : vector<8x128xf32>
    %13 = arith.mulf %10, %12 : vector<8x128xf32>
    %cst_8 = arith.constant 1.000000e+00 : f32
    %14 = vector.broadcast %cst_8 : f32 to vector<8x128xf32>
    %15 = arith.subf %13, %14 : vector<8x128xf32>
    %cst_9 = arith.constant 1.000000e+00 : f32
    %16 = vector.broadcast %cst_9 : f32 to vector<8x128xf32>
    %17 = arith.addf %13, %16 : vector<8x128xf32>
    %18 = tpu.reciprocal %17 {approx = true} : vector<8x128xf32> -> vector<8x128xf32>
    %19 = arith.mulf %15, %18 : vector<8x128xf32>
    %cst_10 = arith.constant 1.000000e+00 : f32
    %20 = vector.broadcast %cst_10 : f32 to vector<8x128xf32>
    %21 = arith.minimumf %19, %20 : vector<8x128xf32>
    %22 = arith.mulf %5, %21 : vector<8x128xf32>
    %c0_11 = arith.constant 0 : index
    %c0_12 = arith.constant 0 : index
    %23 = vector.load %arg4[%c0_11, %c0_12] : memref<8x128xf32, #tpu.memory_space<vmem>>, vector<8x128xf32>
    %cst_13 = arith.constant 0.000000e+00 : f32
    %24 = vector.broadcast %cst_13 : f32 to vector<8x128xf32>
    %25 = arith.cmpf ogt, %23, %24 : vector<8x128xf32>
    %cst_14 = arith.constant 0.000000e+00 : f32
    %26 = vector.broadcast %cst_14 : f32 to vector<8x128xf32>
    %27 = arith.select %25, %22, %26 : vector<8x128xi1>, vector<8x128xf32>
    %c0_15 = arith.constant 0 : index
    %c0_16 = arith.constant 0 : index
    %28 = vector.load %arg5[%c0_15, %c0_16] : memref<8x128xf32, #tpu.memory_space<vmem>>, vector<8x128xf32>
    tpu.vector_store %arg5[%c0_15, %c0_16], %27 {strides = array<i32>} : memref<8x128xf32, #tpu.memory_space<vmem>>, vector<8x128xf32>,
    return
  }
  func.func @transform_0(%arg0: i32) -> (i32, i32) {
    %c0_i32 = arith.constant 0 : i32
    %c0_i32_0 = arith.constant 0 : i32
    return %arg0, %c0_i32 : i32, i32
  }
  func.func @transform_1(%arg0: i32) -> (i32, i32) {
    %c0_i32 = arith.constant 0 : i32
    %c0_i32_0 = arith.constant 0 : i32
    %c0_i32_1 = arith.constant 0 : i32
    return %c0_i32, %c0_i32_0 : i32, i32
  }
  func.func @transform_2(%arg0: i32) -> (i32, i32) {
    %c0_i32 = arith.constant 0 : i32
    %c0_i32_0 = arith.constant 0 : i32
    %c0_i32_1 = arith.constant 0 : i32
    return %c0_i32, %c0_i32_0 : i32, i32
  }
  func.func @transform_3(%arg0: i32) -> (i32, i32) {
    %c0_i32 = arith.constant 0 : i32
    %c0_i32_0 = arith.constant 0 : i32
    return %arg0, %c0_i32 : i32, i32
  }
  func.func @transform_4(%arg0: i32) -> (i32, i32) {
    %c0_i32 = arith.constant 0 : i32
    %c0_i32_0 = arith.constant 0 : i32
    return %arg0, %c0_i32 : i32, i32
  }
}

</mosaic_0001>

<bundles_post_ra>
// kernel: tpu_custom_call.1
= control target key start
LH: loop header
LB: loop body
LE: loop exit
PB: predicated region body
PF: predicated region fallthrough
CT: control target
= control target key end

     0   :  { %9 = vsyncpa [#allocation3], 0  ;;  %s366_s0 = inlined_call_operand.hbm [shape: f32[8,320], index: 0, kind: input, shape index: {}]   ;;  %s367_s1 = inlined_call_operand.hbm [shape: f32[320,128], index: 1, kind: input, shape index: {}]   ;;  %s368_s2 = inlined_call_operand.vmem [shape: f32[1,128], index: 2, kind: input, shape index: {}]   ;;  %s369_s3 = inlined_call_operand.hbm [shape: f32[8,128], index: 3, kind: input, shape index: {}]   ;;  %s370_s4 = inlined_call_operand.hbm [shape: f32[8,128], index: 4, kind: output, shape index: {}]  }
   0x1   :  { %10 = vsyncpa [#allocation6], 0  ;;  %s27_s17 = sshll.u32 %s367_s1, 4  ;;  %s28_s17 = int_to_ptr.hbm [resolvable:$true] %s27_s17 }
   0x2   :  { %11 = vsyncpa [#allocation4], 0  ;;  %s320_s18 = smov [#allocation5]   ;;  %s17_s22 = sshll.u32 %s366_s0, 4  ;;  %s18_s22 = int_to_ptr.hbm [resolvable:$true] %s17_s22 }
   0x3   :  { %s29_s19 = sshll.u32 %s320_s18, 4  ;;  %s321_s23 = smov 128   ;;  %s30_s19 = int_to_ptr.vmem [resolvable:$true] %s29_s19 }
   0x4   :  { %s322_s24 = smov 8   ;;  %s323_s25 = smov [#allocation2]  }
   0x5   :  { %35 = dma.hbm_to_vmem [thread:$0]  %s28_s17, 5120, %s30_s19, [#allocation6], %s321_s23, %s321_s23, %s322_s24  }
   0x6   :  { %s19_s26 = sshll.u32 %s323_s25, 4  ;;  %s43_s29 = sshll.u32 %s369_s3, 4  ;;  %s20_s26 = int_to_ptr.vmem [resolvable:$true] %s19_s26  ;;  %s44_s29 = int_to_ptr.hbm [resolvable:$true] %s43_s29 }
   0x7   :  { %22 = dma.hbm_to_vmem [thread:$0]  %s18_s22, 384, %s20_s26, [#allocation3]  }
   0x8   :  { %s324_s1 = smov [#allocation7]  }
   0x9   :  { %s45_s30 = sshll.u32 %s324_s1, 4  ;;  %s46_s30 = int_to_ptr.vmem [resolvable:$true] %s45_s30 }
   0xa   :  { %48 = dma.hbm_to_vmem [thread:$0]  %s44_s29, 128, %s46_s30, [#allocation6]  }
   0xb   :  { %314 = dma.done.wait [#allocation3], 384  }
   0xc   :  { %315 = vsyncadd [#allocation3], 4294966912 }
   0xd   :  { %316 = dma.done.wait [#allocation6], 5248  }
   0xe   :  { %317 = vsyncadd [#allocation6], 4294962048  ;;  %v79_v0 = vld [vmem:[#allocation5 + $0x78] sm:$0xff]  ;;  %v78_v1 = vld [vmem:[#allocation5 + $0x70] sm:$0xff]  ;;  %vm108_vm0 = vcmask 523264   ;;  %s194_s8 = sshll.u32 %s370_s4, 4  ;;  %s195_s8 = int_to_ptr.hbm [resolvable:$true] %s194_s8 }
   0xf   :  { %v95_v2 = vld [vmem:[#allocation5 + $0xf8] sm:$0xff]  ;;  %112 = vmatpush.msra.mxu0 %v79_v0  ;;  %v94_v3 = vld [vmem:[#allocation5 + $0xf0] sm:$0xff]  ;;  %v77_v4 = vld [vmem:[#allocation5 + $0x68] sm:$0xff] }
  0x10   :  { %132 = vmatpush.msra.mxu1 %v95_v2  ;;  %v93_v5 = vld [vmem:[#allocation5 + $0xe8] sm:$0xff]  ;;  %v76_v6 = vld [vmem:[#allocation5 + $0x60] sm:$0xff]  ;;  %v103_v8 = vld [vmem:[#allocation5 + $0x138] sm:$0xff] }
  0x11   :  { %113 = vmatpush.msra.mxu0 %v78_v1  ;;  %v92_v7 = vld [vmem:[#allocation5 + $0xe0] sm:$0xff]  ;;  %v75_v9 = vld [vmem:[#allocation5 + $0x58] sm:$0xff]  ;;  %160 = vmatpush.msra.mxu2 %v103_v8  ;;  %v102_v11 = vld [vmem:[#allocation5 + $0x130] sm:$0xff] }
  0x12   :  { %133 = vmatpush.msra.mxu1 %v94_v3  ;;  %v91_v10 = vld [vmem:[#allocation5 + $0xd8] sm:$0xff]  ;;  %v101_v12 = vld [vmem:[#allocation5 + $0x128] sm:$0xff]  ;;  %v74_v13 = vld [vmem:[#allocation5 + $0x50] sm:$0xff] }
  0x13   :  { %114 = vmatpush.msra.mxu0 %v77_v4  ;;  %v90_v14 = vld [vmem:[#allocation5 + $0xd0] sm:$0xff]  ;;  %161 = vmatpush.msra.mxu2 %v102_v11  ;;  %v100_v15 = vld [vmem:[#allocation5 + $0x120] sm:$0xff]  ;;  %v73_v16 = vld [vmem:[#allocation5 + $0x48] sm:$0xff] }
  0x14   :  { %134 = vmatpush.msra.mxu1 %v93_v5  ;;  %v89_v17 = vld [vmem:[#allocation5 + $0xc8] sm:$0xff]  ;;  %v99_v18 = vld [vmem:[#allocation5 + $0x118] sm:$0xff]  ;;  %v72_v19 = vld [vmem:[#allocation5 + $0x40] sm:$0xff] }
  0x15   :  { %115 = vmatpush.msra.mxu0 %v76_v6  ;;  %162 = vmatpush.msra.mxu2 %v101_v12  ;;  %v88_v20 = vld [vmem:[#allocation5 + $0xc0] sm:$0xff]  ;;  %v98_v21 = vld [vmem:[#allocation5 + $0x110] sm:$0xff]  ;;  %v71_v22 = vld [vmem:[#allocation5 + $0x38] sm:$0xff] }
  0x16   :  { %135 = vmatpush.msra.mxu1 %v92_v7  ;;  %v87_v23 = vld [vmem:[#allocation5 + $0xb8] sm:$0xff]  ;;  %v97_v24 = vld [vmem:[#allocation5 + $0x108] sm:$0xff]  ;;  %v70_v25 = vld [vmem:[#allocation5 + $0x30] sm:$0xff] }
  0x17   :  { %116 = vmatpush.msra.mxu0 %v75_v9  ;;  %163 = vmatpush.msra.mxu2 %v100_v15  ;;  %v86_v26 = vld [vmem:[#allocation5 + $0xb0] sm:$0xff]  ;;  %v96_v27 = vld [vmem:[#allocation5 + $0x100] sm:$0xff]  ;;  %v69_v28 = vld [vmem:[#allocation5 + $0x28] sm:$0xff] }
  0x18   :  { %136 = vmatpush.msra.mxu1 %v91_v10  ;;  %v85_v29 = vld [vmem:[#allocation5 + $0xa8] sm:$0xff]  ;;  %v63_v30 = vld [vmem:[#allocation2 + $0x10] sm:$0xff]  ;;  %v68_v31 = vld [vmem:[#allocation5 + $0x20] sm:$0xff] }
  0x19   :  { %117 = vmatpush.msra.mxu0 %v74_v13  ;;  %164 = vmatpush.msra.mxu2 %v99_v18  ;;  %v84_v32 = vld [vmem:[#allocation5 + $0xa0] sm:$0xff]  ;;  %v67_v33 = vld [vmem:[#allocation5 + $0x18] sm:$0xff]  ;;  %v66_v35 = vld [vmem:[#allocation5 + $0x10] sm:$0xff] }
  0x1a   :  { %137 = vmatpush.msra.mxu1 %v90_v14  ;;  %v83_v34 = vld [vmem:[#allocation5 + $0x98] sm:$0xff]  ;;  %v82_v36 = vld [vmem:[#allocation5 + $0x90] sm:$0xff]  ;;  %v65_v37 = vld [vmem:[#allocation5 + $0x8] sm:$0xff] }
  0x1b   :  { %118 = vmatpush.msra.mxu0 %v73_v16  ;;  %165 = vmatpush.msra.mxu2 %v98_v21  ;;  %v81_v38 = vld [vmem:[#allocation5 + $0x88] sm:$0xff]  ;;  %v64_v39 = vld [vmem:[#allocation5] sm:$0xff]  ;;  %v62_v42 = vld [vmem:[#allocation2 + $0x8] sm:$0xff] }
  0x1c   :  { %138 = vmatpush.msra.mxu1 %v89_v17  ;;  %v80_v40 = vld [vmem:[#allocation5 + $0x80] sm:$0xff]  ;;  %v61_v41 = vld [vmem:[#allocation2] sm:$0xff] }
  0x1d   :  { %119 = vmatpush.msra.mxu0 %v72_v19  ;;  %166 = vmatpush.msra.mxu2 %v97_v24  ;;  %v213_v43 = vld [vmem:[%s368_s2] ss:$0 sm:$0xff]  ;;  %v183_v59 = vld [vmem:[#allocation7] sm:$0xff]  ;;  %s325_s2 = smov [#allocation8]  }
  0x1e   :  { %139 = vmatpush.msra.mxu1 %v88_v20  ;;  %s192_s5 = sshll.u32 %s325_s2, 4  ;;  %vm184_vm1 = vcmp.gt.f32.partialorder %v183_v59, 0.0  ;;  %s193_s5 = int_to_ptr.vmem [resolvable:$true] %s192_s5 }
  0x1f   :  { %120 = vmatpush.msra.mxu0 %v71_v22  ;;  %167 = vmatpush.msra.mxu2 %v96_v27 }
  0x20   :  { %140 = vmatpush.msra.mxu1 %v87_v23  ;;  %205 = vmatmul.msk.f32.vlgmr.msra.gmra.mxu2 %vm108_vm0, %v63_v30 }
  0x21   :  { %121 = vmatpush.msra.mxu0 %v70_v25 }
  0x22   :  { %141 = vmatpush.msra.mxu1 %v86_v26 }
  0x23   :  { %122 = vmatpush.msra.mxu0 %v69_v28 }
  0x24   :  { %142 = vmatpush.msra.mxu1 %v85_v29 }
  0x25   :  { %123 = vmatpush.msra.mxu0 %v68_v31 }
  0x26   :  { %143 = vmatpush.msra.mxu1 %v84_v32 }
  0x27   :  { %124 = vmatpush.msra.mxu0 %v67_v33 }
  0x28   :  { %144 = vmatpush.msra.mxu1 %v83_v34 }
  0x29   :  { %125 = vmatpush.msra.mxu0 %v66_v35 }
  0x2a   :  { %145 = vmatpush.msra.mxu1 %v82_v36 }
  0x2b   :  { %126 = vmatpush.msra.mxu0 %v65_v37 }
  0x2c   :  { %146 = vmatpush.msra.mxu1 %v81_v38 }
  0x2d   :  { %127 = vmatpush.msra.mxu0 %v64_v39 }
  0x2e   :  { %147 = vmatpush.msra.mxu1 %v80_v40  ;;  %128 = vmatmul.f32.vlgmr.msra.gmra.mxu0 %v61_v41 }
  0x2f   :  { %148 = vmatmul.f32.vlgmr.msra.gmra.mxu1 %v62_v42 }
  0xa3   :  { %v169_v47 = vpop.f32.mrf.mxu2 }
  0xab   :  { %v129_v44 = vpop.f32.mrf.mxu0 }
  0xac   :  { %v149_v45 = vpop.f32.mrf.mxu1  ;;  %v130_v46 = vadd.f32 %v213_v43, %v129_v44 }
  0xae   :  { %v150_v48 = vadd.f32 %v149_v45, %v130_v46 }
  0xb0   :  { %v170_v49 = vadd.f32 %v169_v47, %v150_v48 }
  0xb2   :  { %v172_v50 = vmin.f32 %v170_v49, 20.0 }
  0xb4   :  { %v173_v51 = vmul.f32 1.442695, %v172_v50 }
  0xb6   :  { %214 = vpow2.f32 %v173_v51 }
  0xbc   :  { %v215_v52 = vpop.eup %214 }
  0xbd   :  { %v175_v53 = vadd.f32 1.0, %v215_v52 }
  0xbf   :  { %v176_v54 = vmul.f32 %v175_v53, %v175_v53 }
  0xc1   :  { %v178_v55 = vadd.f32 1.0, %v176_v54  ;;  %v206_v56 = vadd.f32 -1.0, %v176_v54 }
  0xc3   :  { %216 = vrcp.f32 %v178_v55 }
  0xc9   :  { %v217_v57 = vpop.eup %216 }
  0xca   :  { %v180_v58 = vmul.f32 %v217_v57, %v206_v56 }
  0xcc   :  { %v181_v60 = vmin.f32 %v180_v58, 1.0 }
  0xce   :  { %v182_v61 = vmul.f32 %v181_v60, %v170_v49 }
  0xd0   :  { %v185_v62 = vsel %vm184_vm1, %v182_v61, 0.0 }
  0xd1   :  { %186 = vst [vmem:[#allocation8] sm:$0xff] %v185_v62 }
  0xd2   :  { %197 = dma.vmem_to_hbm [thread:$0]  %s193_s5, 128, %s195_s8, [#allocation4]  }
  0xd3   :  { %318 = dma.done.wait [#allocation4], 128  }
  0xd4   :  { %319 = vsyncadd [#allocation4], 4294967168 }
  0xd5   :  { %202 = vsyncpa [#allocation3], 1 }
  0xd6   :  { %203 = vsyncpa [#allocation6], 1 }
  0xd7   :  { %204 = vsyncpa [#allocation4], 1 }

</bundles_post_ra>
